<compile_context>
chip_gen: v7x
topology: tpu7x:2x2x1
jax: 0.10.0
libtpu: 0.0.40
codegen_flags: <defaults>
</compile_context>

<pallas_src>
import jax
import jax.numpy as jnp
from jax.experimental import pallas as pl
from jax.experimental.pallas import tpu as pltpu

# ---- model dims ------------------------------------------------------------
IN_F = 37      # input features
HID = 12       # hidden width (fc1/fc2 out)
N_ACT = 4      # number of actions (advantage head width)

# ---- padded slab layout (rows x 128 lanes, f32) ----------------------------
K1 = 40                      # 37 -> 40 (sublane multiple of 8) contraction dim for fc1
LANES = 128
R_W1 = 0                     # rows   0: 40  W1  (valid 37x12)
R_B1 = 40                    # row   40      b1  (valid cols 0:12)
R_W2 = 48                    # rows  48:176  W2  (128x128, valid 12x12)
R_B2 = 176                   # row  176      b2  (valid cols 0:12)
R_WH = 184                   # rows 184:312  fused head W (128x128, valid 12x5)
R_BH = 312                   # row  312      fused head bias (valid cols 0:5)
SLAB_ROWS = 320              # 320 * 128 * 4B = 160 KiB


def dueling_q_kernel(x_ref, p_ref, o_ref):
    x = x_ref[...]                                   # (B, K1), zero-padded features

    # Static, sublane-aligned sub-views of the single parameter slab.
    w1 = p_ref[R_W1:R_W1 + K1, :]                    # (40, 128)
    b1 = p_ref[R_B1:R_B1 + 1, :]                     # (1, 128)
    w2 = p_ref[R_W2:R_W2 + LANES, :]                 # (128, 128)
    b2 = p_ref[R_B2:R_B2 + 1, :]                     # (1, 128)
    wh = p_ref[R_WH:R_WH + LANES, :]                 # (128, 128) fused heads
    bh = p_ref[R_BH:R_BH + 1, :]                     # (1, 128)

    # fc1 + ReLU  (padded lanes stay exactly zero through the ReLUs)
    h1 = jnp.maximum(jnp.dot(x, w1, preferred_element_type=jnp.float32) + b1, 0.0)
    # fc2 + ReLU
    h2 = jnp.maximum(jnp.dot(h1, w2, preferred_element_type=jnp.float32) + b2, 0.0)
    # fused value + advantage heads: cols 0:4 = advantages, col 4 = value
    heads = jnp.dot(h2, wh, preferred_element_type=jnp.float32) + bh

    adv = heads[:, :N_ACT]                           # (B, 4)
    val = heads[:, N_ACT:N_ACT + 1]                  # (B, 1)

    # torch `advantages.mean()` = GLOBAL scalar mean over all B*4 elements.
    # Sum only the 4 valid columns so lane padding cannot pollute the mean.
    b = adv.shape[0]
    adv_mean = jnp.sum(adv) * (1.0 / (b * N_ACT))
    o_ref[...] = val + (adv - adv_mean)


def dueling_q_forward(x, param_slab):
    B = x.shape[0]
    # Pad features 37 -> 40 (zeros) so the fc1 contraction dim matches the
    # pre-padded slab and stays sublane-aligned.
    x_pad = jnp.pad(x, ((0, 0), (0, K1 - IN_F)))
    # TODO(synk): for large-batch inference, tile the batch axis (grid over B)
    # and restructure the global advantage mean as an accumulate-then-finalize
    # two-pass reduction; the global mean couples all batch rows, so the tiny-B
    # case here stays a single grid step with everything resident in VMEM.
    return pl.pallas_call(
        dueling_q_kernel,
        grid=(1,),
        in_specs=[
            pl.BlockSpec((B, K1), lambda i: (0, 0)),
            pl.BlockSpec((SLAB_ROWS, LANES), lambda i: (0, 0)),
        ],
        out_specs=pl.BlockSpec((B, N_ACT), lambda i: (0, 0)),
        out_shape=jax.ShapeDtypeStruct((B, N_ACT), jnp.float32),
        compiler_params=pltpu.CompilerParams(
            dimension_semantics=("arbitrary",)),
    )(x_pad, param_slab)


dueling_q_forward_jit = jax.jit(dueling_q_forward)


# ---- host-side parameter construction / packing ----------------------------
def init_params(key):
    """Deterministic synthetic init matching the torch module's layer shapes.
    torch stores Linear weight as (out, in); we keep the transposed (in, out)."""
    ks = jax.random.split(key, 8)

    def lin(kw, kb, fan_in, fan_out):
        bound = 1.0 / jnp.sqrt(fan_in)
        w = jax.random.uniform(kw, (fan_in, fan_out), jnp.float32, -bound, bound)
        b = jax.random.uniform(kb, (1, fan_out), jnp.float32, -bound, bound)
        return w, b

    w1, b1 = lin(ks[0], ks[1], IN_F, HID)   # fc1
    w2, b2 = lin(ks[2], ks[3], HID, HID)    # fc2
    w3, b3 = lin(ks[4], ks[5], HID, N_ACT)  # fc3 (advantages)
    wv, bv = lin(ks[6], ks[7], HID, 1)      # value
    return (w1, b1, w2, b2, w3, b3, wv, bv)


def pack_params(params):
    """Pack all layers into one pre-padded (320, 128) f32 slab (done ONCE)."""
    w1, b1, w2, b2, w3, b3, wv, bv = params
    slab = jnp.zeros((SLAB_ROWS, LANES), jnp.float32)
    slab = slab.at[R_W1:R_W1 + IN_F, :HID].set(w1)
    slab = slab.at[R_B1, :HID].set(b1.reshape(-1))
    slab = slab.at[R_W2:R_W2 + HID, :HID].set(w2)
    slab = slab.at[R_B2, :HID].set(b2.reshape(-1))
    # fused head: cols 0:3 = advantages (fc3), col 4 = value
    slab = slab.at[R_WH:R_WH + HID, :N_ACT].set(w3)
    slab = slab.at[R_WH:R_WH + HID, N_ACT].set(wv.reshape(-1))
    slab = slab.at[R_BH, :N_ACT].set(b3.reshape(-1))
    slab = slab.at[R_BH, N_ACT].set(bv.reshape(()))
    return slab


def reference_forward(x, params):
    w1, b1, w2, b2, w3, b3, wv, bv = params
    h1 = jnp.maximum(x @ w1 + b1, 0.0)
    h2 = jnp.maximum(h1 @ w2 + b2, 0.0)
    values = h2 @ wv + bv
    adv = h2 @ w3 + b3
    return values + (adv - jnp.mean(adv))


if __name__ == "__main__":
    key = jax.random.PRNGKey(0)
    k_x, k_p = jax.random.split(key)
    B = 8
    x = jax.random.normal(k_x, (B, IN_F), jnp.float32)
    params = init_params(k_p)
    slab = pack_params(params)

    out = jax.block_until_ready(dueling_q_forward_jit(x, slab))
    ref = reference_forward(x, params)

    assert out.shape == (B, N_ACT)
    assert jnp.allclose(out, ref, atol=1e-5, rtol=1e-5)
    print("KERNEL_OK")
</pallas_src>

<mosaic_0001>
module attributes {stable_mosaic.version = 11 : i64} {
  func.func @dueling_q_kernel(%arg0: i32, %arg1: memref<8x40xf32, #tpu.memory_space<vmem>>, %arg2: memref<320x128xf32, #tpu.memory_space<vmem>>, %arg3: memref<8x4xf32, #tpu.memory_space<vmem>>) attributes {dimension_semantics = [#tpu.dimension_semantics<arbitrary>], iteration_bounds = array<i64: 1>, scalar_prefetch = 0 : i64, scratch_operands = 0 : i64, tpu.core_type = #tpu.core_type<tc>, window_params = [{pipeline_mode = #tpu.pipeline_mode<synchronous>, transform_indices = @transform_0, window_bounds = array<i64: 8, 40>}, {pipeline_mode = #tpu.pipeline_mode<synchronous>, transform_indices = @transform_1, window_bounds = array<i64: 320, 128>}, {pipeline_mode = #tpu.pipeline_mode<synchronous>, transform_indices = @transform_2, window_bounds = array<i64: 8, 4>}]} {
    %c0 = arith.constant 0 : index
    %c0_0 = arith.constant 0 : index
    %0 = vector.load %arg1[%c0, %c0_0] : memref<8x40xf32, #tpu.memory_space<vmem>>, vector<8x40xf32>
    %c0_1 = arith.constant 0 : index
    %c0_2 = arith.constant 0 : index
    %1 = vector.load %arg2[%c0_1, %c0_2] : memref<320x128xf32, #tpu.memory_space<vmem>>, vector<40x128xf32>
    %c40 = arith.constant 40 : index
    %c0_3 = arith.constant 0 : index
    %2 = vector.load %arg2[%c40, %c0_3] : memref<320x128xf32, #tpu.memory_space<vmem>>, vector<1x128xf32>
    %c48 = arith.constant 48 : index
    %c0_4 = arith.constant 0 : index
    %3 = vector.load %arg2[%c48, %c0_4] : memref<320x128xf32, #tpu.memory_space<vmem>>, vector<128x128xf32>
    %c176 = arith.constant 176 : index
    %c0_5 = arith.constant 0 : index
    %4 = vector.load %arg2[%c176, %c0_5] : memref<320x128xf32, #tpu.memory_space<vmem>>, vector<1x128xf32>
    %c184 = arith.constant 184 : index
    %c0_6 = arith.constant 0 : index
    %5 = vector.load %arg2[%c184, %c0_6] : memref<320x128xf32, #tpu.memory_space<vmem>>, vector<128x128xf32>
    %c312 = arith.constant 312 : index
    %c0_7 = arith.constant 0 : index
    %6 = vector.load %arg2[%c312, %c0_7] : memref<320x128xf32, #tpu.memory_space<vmem>>, vector<1x128xf32>
    %cst = arith.constant dense<0.000000e+00> : vector<8x128xf32>
    %7 = tpu.matmul %0, %1, %cst {dimension_numbers = #tpu.dot_dimension_numbers<[1], [0], [0], [1], [0, 0, 1, 1], [], []>} : vector<8x40xf32>, vector<40x128xf32>, vector<8x128xf32> -> vector<8x128xf32>
    %8 = vector.broadcast %2 : vector<1x128xf32> to vector<8x128xf32>
    %9 = arith.addf %7, %8 : vector<8x128xf32>
    %cst_8 = arith.constant 0.000000e+00 : f32
    %10 = vector.broadcast %cst_8 : f32 to vector<8x128xf32>
    %11 = arith.maximumf %9, %10 : vector<8x128xf32>
    %cst_9 = arith.constant dense<0.000000e+00> : vector<8x128xf32>
    %12 = tpu.matmul %11, %3, %cst_9 {dimension_numbers = #tpu.dot_dimension_numbers<[1], [0], [0], [1], [0, 0, 1, 1], [], []>} : vector<8x128xf32>, vector<128x128xf32>, vector<8x128xf32> -> vector<8x128xf32>
    %13 = vector.broadcast %4 : vector<1x128xf32> to vector<8x128xf32>
    %14 = arith.addf %12, %13 : vector<8x128xf32>
    %cst_10 = arith.constant 0.000000e+00 : f32
    %15 = vector.broadcast %cst_10 : f32 to vector<8x128xf32>
    %16 = arith.maximumf %14, %15 : vector<8x128xf32>
    %cst_11 = arith.constant dense<0.000000e+00> : vector<8x128xf32>
    %17 = tpu.matmul %16, %5, %cst_11 {dimension_numbers = #tpu.dot_dimension_numbers<[1], [0], [0], [1], [0, 0, 1, 1], [], []>} : vector<8x128xf32>, vector<128x128xf32>, vector<8x128xf32> -> vector<8x128xf32>
    %18 = vector.broadcast %6 : vector<1x128xf32> to vector<8x128xf32>
    %19 = arith.addf %17, %18 : vector<8x128xf32>
    %20 = vector.extract_strided_slice %19 {offsets = [0, 0], sizes = [8, 4], strides = [1, 1]} : vector<8x128xf32> to vector<8x4xf32>
    %21 = vector.extract_strided_slice %19 {offsets = [0, 4], sizes = [8, 1], strides = [1, 1]} : vector<8x128xf32> to vector<8x1xf32>
    %22 = vector.shape_cast %20 : vector<8x4xf32> to vector<1x8x4xf32>
    %cst_12 = arith.constant dense<0.000000e+00> : vector<1xf32>
    %23 = vector.multi_reduction <add>, %22, %cst_12 [1, 2] : vector<1x8x4xf32> to vector<1xf32>
    %24 = vector.shape_cast %23 : vector<1xf32> to vector<1x1x1xf32>
    %25 = vector.extract %24[0, 0, 0] : f32 from vector<1x1x1xf32>
    %cst_13 = arith.constant 3.125000e-02 : f32
    %26 = arith.mulf %25, %cst_13 : f32
    %27 = vector.broadcast %26 : f32 to vector<8x4xf32>
    %28 = arith.subf %20, %27 : vector<8x4xf32>
    %29 = vector.broadcast %21 : vector<8x1xf32> to vector<8x4xf32>
    %30 = arith.addf %29, %28 : vector<8x4xf32>
    %c0_14 = arith.constant 0 : index
    %c0_15 = arith.constant 0 : index
    %31 = vector.load %arg3[%c0_14, %c0_15] : memref<8x4xf32, #tpu.memory_space<vmem>>, vector<8x4xf32>
    tpu.vector_store %arg3[%c0_14, %c0_15], %30 {strides = array<i32>} : memref<8x4xf32, #tpu.memory_space<vmem>>, vector<8x4xf32>,
    return
  }
  func.func @transform_0(%arg0: i32) -> (i32, i32) {
    %c0_i32 = arith.constant 0 : i32
    %c0_i32_0 = arith.constant 0 : i32
    %c0_i32_1 = arith.constant 0 : i32
    return %c0_i32, %c0_i32_0 : i32, i32
  }
  func.func @transform_1(%arg0: i32) -> (i32, i32) {
    %c0_i32 = arith.constant 0 : i32
    %c0_i32_0 = arith.constant 0 : i32
    %c0_i32_1 = arith.constant 0 : i32
    return %c0_i32, %c0_i32_0 : i32, i32
  }
  func.func @transform_2(%arg0: i32) -> (i32, i32) {
    %c0_i32 = arith.constant 0 : i32
    %c0_i32_0 = arith.constant 0 : i32
    %c0_i32_1 = arith.constant 0 : i32
    return %c0_i32, %c0_i32_0 : i32, i32
  }
}

</mosaic_0001>

<bundles_post_ra>
// kernel: dueling_q_forward.1
= control target key start
LH: loop header
LB: loop body
LE: loop exit
PB: predicated region body
PF: predicated region fallthrough
CT: control target
= control target key end

     0   :  { %7 = vsyncpa [#allocation3], 0  ;;  %s535_s9 = smov [#allocation2]   ;;  %s598_s0 = inlined_call_operand.vmem [shape: f32[8,40], index: 0, kind: input, shape index: {}]   ;;  %s599_s1 = inlined_call_operand.hbm [shape: f32[320,128], index: 1, kind: input, shape index: {}]   ;;  %s600_s2 = inlined_call_operand.vmem [shape: f32[8,4], index: 2, kind: output, shape index: {}]  }
   0x1   :  { %s15_s10 = sshll.u32 %s535_s9, 4  ;;  %s511_s13 = scalar_lea.hbm %s599_s1, 5120  ;;  %s16_s10 = int_to_ptr.vmem [resolvable:$true] %s15_s10 }
   0x2   :  { %p512_p0 = scmp.ne.s32.totalorder %s599_s1, %s511_s13  ;;  %p515_p1 = scmp.lt.u32.totalorder %s511_s13, %s599_s1 }
   0x4   :  { %p517_p2 = pnand %p515_p1, %p512_p0 }
   0x6   :  { %520 = shalt.err (!%p517_p2)
}
   0x7   :  { %s521_s18 = scalar_lea.vmem %s16_s10, 5120  ;;  %p526_p4 = scmp.lt.s32.totalorder %s16_s10, %s16_s10 }
   0x8   :  { %p522_p3 = scmp.ne.s32.totalorder %s16_s10, %s521_s18  ;;  %p527_p5 = scmp.lt.s32.totalorder %s521_s18, %s521_s18 }
   0xa   :  { %p528_p6 = por %p527_p5, %p526_p4 }
   0xc   :  { %p529_p7 = pnand %p528_p6, %p522_p3 }
   0xe   :  { %532 = shalt.err (!%p529_p7)
}
   0xf   :  { %s536_s19 = smov 128   ;;  %s537_s20 = smov 8  }
  0x10   :  { %21 = dma.hbm_to_vmem [thread:$0]  %s599_s1, 5120, %s16_s10, [#allocation3], %s536_s19, %s536_s19, %s537_s20  }
  0x11   :  { %533 = dma.done.wait [#allocation3], 5120  }
  0x12   :  { %534 = vsyncadd [#allocation3], 4294962176  ;;  %v538_v0 = vmov 0.0|0.0   ;;  %vm539_vm0 = vmmov 0   ;;  %v540_v1 = vmov 0.0   ;;  %v26_v2 = vld [vmem:[#allocation2] sm:$0xff] }
  0x13   :  { %447 = vmatprep.subr.bf16.mxu0 %v538_v0  ;;  %374 = vmatprep.mubr.msk.f32.mxu0 %vm539_vm0, %v540_v1  ;;  %v27_v3 = vld [vmem:[#allocation2 + $0x8] sm:$0xff]  ;;  %v28_v4 = vld [vmem:[#allocation2 + $0x10] sm:$0xff]  ;;  %v29_v6 = vld [vmem:[#allocation2 + $0x18] sm:$0xff]  ;;  %vm70_vm1 = vcmask 326656   ;;  %vm294_vm2 = vcmask 31744  }
  0x14   :  { %453 = vmatprep.subr.bf16.mxu1 %v538_v0  ;;  %409 = vmatprep.mubr.msk.f32.mxu1 %vm539_vm0, %v540_v1  ;;  %v448_v5 = vpack.c.bf16 %v27_v3, %v26_v2  ;;  %v32_v7 = vld [vmem:[#allocation2 + $0x30] sm:$0xff]  ;;  %v33_v8 = vld [vmem:[#allocation2 + $0x38] sm:$0xff]  ;;  %v34_v9 = vld [vmem:[#allocation2 + $0x40] sm:$0xff]  ;;  %v451_v10 = vpack.c.bf16 %v29_v6, %v28_v4 }
  0x15   :  { %v454_v11 = vpack.c.bf16 %v33_v8, %v32_v7  ;;  %v35_v12 = vld [vmem:[#allocation2 + $0x48] sm:$0xff]  ;;  %v36_v14 = vld [vmem:[#allocation2 + $0x50] sm:$0xff]  ;;  %v37_v15 = vld [vmem:[#allocation2 + $0x58] sm:$0xff] }
  0x16   :  { %449 = vmatpush3.bf16.msra.mxu0 %v448_v5  ;;  %v457_v13 = vpack.c.bf16 %v35_v12, %v34_v9  ;;  %v30_v16 = vld [vmem:[#allocation2 + $0x20] sm:$0xff]  ;;  %v460_v18 = vpack.c.bf16 %v37_v15, %v36_v14  ;;  %v39_v20 = vld [vmem:[#allocation2 + $0x68] sm:$0xff]  ;;  %v40_v22 = vld [vmem:[#allocation2 + $0x70] sm:$0xff]  ;;  %v541_v5 = vmov 4  }
  0x17   :  { %450 = vmatprep.subr.bf16.mxu0 %v538_v0  ;;  %455 = vmatpush3.bf16.msra.mxu1 %v454_v11  ;;  %v25_v17 = vld [vmem:[%s598_s0] sm:$0xff]  ;;  %v41_v23 = vld [vmem:[#allocation2 + $0x78] sm:$0xff]  ;;  %v43_v26 = vld [vmem:[#allocation2 + $0x88] sm:$0xff] }
  0x18   :  { %456 = vmatprep.subr.bf16.mxu1 %v538_v0  ;;  %v38_v19 = vld [vmem:[#allocation2 + $0x60] sm:$0xff]  ;;  %v466_v24 = vpack.c.bf16 %v41_v23, %v40_v22  ;;  %v44_v28 = vld [vmem:[#allocation2 + $0x90] sm:$0xff]  ;;  %v45_v29 = vld [vmem:[#allocation2 + $0x98] sm:$0xff]  ;;  %510 = vset.pattern.permute.xlu0 %v541_v5 }
  0x19   :  { %v463_v21 = vpack.c.bf16 %v39_v20, %v38_v19  ;;  %v42_v25 = vld [vmem:[#allocation2 + $0x80] sm:$0xff]  ;;  %v472_v30 = vpack.c.bf16 %v45_v29, %v44_v28  ;;  %v47_v32 = vld [vmem:[#allocation2 + $0xa8] sm:$0xff]  ;;  %v49_v34 = vld [vmem:[#allocation2 + $0xb8] sm:$0xff] }
  0x1a   :  { %452 = vmatpush3.bf16.msra.mxu0 %v451_v10  ;;  %v469_v27 = vpack.c.bf16 %v43_v26, %v42_v25  ;;  %v46_v31 = vld [vmem:[#allocation2 + $0xa0] sm:$0xff]  ;;  %v51_v36 = vld [vmem:[#allocation2 + $0xc8] sm:$0xff]  ;;  %v52_v38 = vld [vmem:[#allocation2 + $0xd0] sm:$0xff] }
  0x1b   :  { %372 = vmatprep.subr.mxu0 %v540_v1  ;;  %458 = vmatpush3.bf16.msra.mxu1 %v457_v13  ;;  %v475_v33 = vpack.c.bf16 %v47_v32, %v46_v31  ;;  %v50_v35 = vld [vmem:[#allocation2 + $0xc0] sm:$0xff]  ;;  %v481_v39 = vpack.c.bf16 %v52_v38, %v51_v36  ;;  %v53_v40 = vld [vmem:[#allocation2 + $0xd8] sm:$0xff]  ;;  %v55_v43 = vld [vmem:[#allocation2 + $0xe8] sm:$0xff] }
  0x1c   :  { %459 = vmatprep.subr.bf16.mxu1 %v538_v0  ;;  %v478_v37 = vpack.c.bf16 %v50_v35, %v49_v34  ;;  %v54_v41 = vld [vmem:[#allocation2 + $0xe0] sm:$0xff]  ;;  %v56_v44 = vld [vmem:[#allocation2 + $0xf0] sm:$0xff]  ;;  %v57_v46 = vld [vmem:[#allocation2 + $0xf8] sm:$0xff] }
  0x1d   :  { %v484_v42 = vpack.c.bf16 %v54_v41, %v53_v40  ;;  %v487_v45 = vpack.c.bf16 %v56_v44, %v55_v43  ;;  %v58_v47 = vld [vmem:[#allocation2 + $0x100] sm:$0xff]  ;;  %v59_v49 = vld [vmem:[#allocation2 + $0x108] sm:$0xff]  ;;  %v60_v50 = vld [vmem:[#allocation2 + $0x110] sm:$0xff] }
  0x1e   :  { %373 = vmatpush3.msra.mxu0 %v30_v16  ;;  %v490_v48 = vpack.c.bf16 %v58_v47, %v57_v46  ;;  %v493_v51 = vpack.c.bf16 %v60_v50, %v59_v49  ;;  %v61_v52 = vld [vmem:[#allocation2 + $0x118] sm:$0xff]  ;;  %v62_v53 = vld [vmem:[#allocation2 + $0x120] sm:$0xff]  ;;  %v320_v55 = vld [vmem:[#allocation2 + $0x28] ss:$0 sm:$0xff] }
  0x1f   :  { %375 = vmatmul.mubr.msk.f32.vlgmr.msra.gmra.mrb[0].mxu0 %vm70_vm1, %v25_v17  ;;  %477 = vmatprep.subr.bf16.mxu0 %v538_v0  ;;  %v496_v54 = vpack.c.bf16 %v62_v53, %v61_v52  ;;  %v63_v60 = vld [vmem:[#allocation2 + $0x128] sm:$0xff]  ;;  %v64_v61 = vld [vmem:[#allocation2 + $0x130] sm:$0xff]  ;;  %v323_v6 = vld [vmem:[#allocation2 + $0x138] ss:$0 sm:$0xff] }
  0x20   :  { %461 = vmatpush3.bf16.msra.mxu1 %v460_v18  ;;  %444 = vmatprep.mubr.msk.f32.mxu0 %vm539_vm0, %v540_v1  ;;  %v499_v62 = vpack.c.bf16 %v64_v61, %v63_v60  ;;  %v322_v63 = vld [vmem:[#allocation2 + $0xb0] ss:$0 sm:$0xff] }
  0x21   :  { %462 = vmatprep.subr.bf16.mxu1 %v538_v0  ;;  %479 = vmatpush3.bf16.msra.mxu0 %v478_v37 }
  0x22   :  { %480 = vmatprep.subr.bf16.mxu0 %v538_v0 }
  0x24   :  { %464 = vmatpush3.bf16.msra.mxu1 %v463_v21 }
  0x25   :  { %465 = vmatprep.subr.bf16.mxu1 %v538_v0  ;;  %482 = vmatpush3.bf16.msra.mxu0 %v481_v39 }
  0x26   :  { %483 = vmatprep.subr.bf16.mxu0 %v538_v0 }
  0x28   :  { %467 = vmatpush3.bf16.msra.mxu1 %v466_v24 }
  0x29   :  { %468 = vmatprep.subr.bf16.mxu1 %v538_v0  ;;  %485 = vmatpush3.bf16.msra.mxu0 %v484_v42 }
  0x2a   :  { %486 = vmatprep.subr.bf16.mxu0 %v538_v0 }
  0x2c   :  { %470 = vmatpush3.bf16.msra.mxu1 %v469_v27 }
  0x2d   :  { %471 = vmatprep.subr.bf16.mxu1 %v538_v0  ;;  %488 = vmatpush3.bf16.msra.mxu0 %v487_v45 }
  0x2e   :  { %489 = vmatprep.subr.bf16.mxu0 %v538_v0 }
  0x30   :  { %473 = vmatpush3.bf16.msra.mxu1 %v472_v30 }
  0x31   :  { %474 = vmatprep.subr.bf16.mxu1 %v538_v0  ;;  %491 = vmatpush3.bf16.msra.mxu0 %v490_v48 }
  0x32   :  { %492 = vmatprep.subr.bf16.mxu0 %v538_v0 }
  0x34   :  { %476 = vmatpush3.bf16.msra.mxu1 %v475_v33 }
  0x35   :  { %494 = vmatpush3.bf16.msra.mxu0 %v493_v51 }
  0x36   :  { %495 = vmatprep.subr.bf16.mxu0 %v538_v0 }
  0x39   :  { %497 = vmatpush3.bf16.msra.mxu0 %v496_v54 }
  0x3a   :  { %498 = vmatprep.subr.bf16.mxu0 %v538_v0 }
  0x3d   :  { %500 = vmatpush3.bf16.msra.mxu0 %v499_v62 }
  0xf2   :  { %v140_v56 = vpop.f32.mrb[0].mxu0 }
  0xf3   :  { %v141_v57 = vadd.f32 %v320_v55, %v140_v56  ;;  %v376_v58 = vpop.f32.mrb[1].mxu0 }
  0xf5   :  { %v144_v59 = vmax.f32 %v141_v57, 0.0 }
  0xf7   :  { %410 = vmatmul.mubr.f32.vlgmr.msra.gmra.mrb[0].mxu1 %v144_v59 }
 0x1ca   :  { %v215_v1 = vpop.f32.mrb[0].mxu1 }
 0x1cb   :  { %v216_v2 = vadd.f32 %v322_v63, %v215_v1  ;;  %v411_v3 = vpop.f32.mrb[1].mxu1 }
 0x1cd   :  { %v219_v4 = vmax.f32 %v216_v2, 0.0 }
 0x1cf   :  { %445 = vmatmul.mubr.f32.vlgmr.msra.gmra.mrb[2].mxu0 %v219_v4 }
 0x2a2   :  { %v290_v0 = vpop.f32.mrb[2].mxu0 }
 0x2a3   :  { %v291_v7 = vadd.f32 %v323_v6, %v290_v0  ;;  %v446_v8 = vpop.f32.mrb[3].mxu0 }
 0x2a5   :  { %v295_v9 = vsel %vm294_vm2, %v291_v7, 0.0 }
 0x2a6   :  { %296 = vadd.xlane.f32.xlu0 %v295_v9 }
 0x2bc   :  { %310 = vperm.xlu0 %510, %v291_v7  }
 0x333   :  { %v297_v10 = vpop.xlane.xlu0 %296 }
 0x334   :  { %v298_v11 = vrot.slane %v297_v10, 4 }
 0x336   :  { %v299_v12 = vadd.f32 %v298_v11, %v297_v10 }
 0x338   :  { %v300_v13 = vrot.slane %v299_v12, 2 }
 0x33a   :  { %v301_v14 = vadd.f32 %v300_v13, %v299_v12 }
 0x33b   :  { %v311_v19 = vpop.permute.xlu0 %310 }
 0x33c   :  { %v302_v15 = vrot.slane %v301_v14, 1 }
 0x33e   :  { %v303_v16 = vadd.f32 %v302_v15, %v301_v14 }
 0x340   :  { %501 = vpush %v303_v16 }
 0x371   :  { %s502_s0 = spop %501 }
 0x372   :  { %s305_s24 = smul.f32 0.03125, %s502_s0 }
 0x374   :  { %v306_v17 = vstv %s305_s24 }
 0x375   :  { %v307_v18 = vsub.f32 %v291_v7, %v306_v17 }
 0x377   :  { %v313_v20 = vadd.f32 %v311_v19, %v307_v18 }
 0x379   :  { %314 = vst.msk [vmem:[%s600_s2] sm:$0xff] %vm294_vm2, %v313_v20 }
 0x37a   :  { %319 = vsyncpa [#allocation3], 1 }

</bundles_post_ra>
